<compile_context>
chip_gen: v7x
topology: tpu7x:2x2x1
jax: 0.10.0
libtpu: 0.0.40
codegen_flags: <defaults>
</compile_context>

<pallas_src>
import jax
import jax.numpy as jnp
from jax import lax
from jax.experimental import pallas as pl
from jax.experimental.pallas import tpu as pltpu


# ----------------------------- Pallas kernel --------------------------------

def _fused_forward_kernel(x_ref, w_ref, b_ref, o_ref):
    # x_ref: (M, D) f32, D = C*H*W (channel-major flatten of NCHW)
    # w_ref: (3, D, D) f32 packed dense per-layer weight matrices
    # b_ref: (3, 1, D) f32 packed per-layer biases
    x = x_ref[...]
    # AvgPool2d(2, stride=2, pad=1, ceil_mode=True, count_include_pad=True)
    # at H=W=2 reduces exactly to x / 4 (pure VPU, no MXU pass).
    v1 = x * 0.25
    # Hoist the v1 + b_i sums off the serial matmul critical path; they hide
    # under the first matmul's MXU latency.
    vb0 = v1 + b_ref[0]
    vb1 = v1 + b_ref[1]
    vb2 = v1 + b_ref[2]
    cur = x
    for i, vb in enumerate((vb0, vb1, vb2)):
        acc = jnp.dot(cur, w_ref[i], preferred_element_type=jnp.float32)
        cur = jnp.maximum(acc + vb, 0.0)
    o_ref[...] = cur.astype(o_ref.dtype)


def fused_forward(x_flat, w_all, b_all):
    """x_flat: (M, D) f32; w_all: (3, D, D) f32; b_all: (3, 1, D) f32."""
    M, D = x_flat.shape
    flops = 3 * 2 * M * D * D
    bytes_accessed = (2 * M * D + w_all.size + b_all.size) * 4
    vmem_spec = pl.BlockSpec(memory_space=pltpu.MemorySpace.VMEM)
    return pl.pallas_call(
        _fused_forward_kernel,
        out_shape=jax.ShapeDtypeStruct((M, D), jnp.float32),
        in_specs=[vmem_spec, vmem_spec, vmem_spec],
        out_specs=vmem_spec,
        cost_estimate=pl.CostEstimate(flops=flops, transcendentals=0,
                                      bytes_accessed=bytes_accessed),
    )(x_flat, w_all, b_all)


# ----------------------- parameter packing (done ONCE) ----------------------

def init_conv_params(key, cout, cin, k):
    wkey, bkey = jax.random.split(key)
    bound = (cin * k * k) ** -0.5
    w = jax.random.uniform(wkey, (cout, cin, k, k), jnp.float32, -bound, bound)
    b = jax.random.uniform(bkey, (cout,), jnp.float32, -bound, bound)
    return w, b


def pack_weight_matrix(w, H, W, pad):
    """(Cout, Cin, K, K) conv weight -> dense (C*H*W, C*H*W) matrix.

    Exact when every output window of the stride-1, pad=`pad` conv covers the
    whole real input (H, W <= pad + 1):
        out[n, cout, oh, ow] = sum_{cin,ih,iw} x[n,cin,ih,iw]
                               * w[cout, cin, ih+pad-oh, iw+pad-ow]
    The flatten order is channel-major (plain NCHW reshape), so the wrapper
    needs no transpose.
    """
    Cout, Cin, K, _ = w.shape
    assert H <= pad + 1 and W <= pad + 1 and K == 2 * pad + 1
    big = jnp.zeros((Cin, H, W, Cout, H, W), jnp.float32)
    for ih in range(H):
        for iw in range(W):
            for oh in range(H):
                for ow in range(W):
                    kh, kw = ih + pad - oh, iw + pad - ow
                    big = big.at[:, ih, iw, :, oh, ow].set(w[:, :, kh, kw].T)
    return big.reshape(Cin * H * W, Cout * H * W)


def pack_params(params, H, W, pad=3):
    """-> (w_all (3, D, D), b_all (3, 1, D)) with D = C*H*W."""
    HW = H * W
    w_mats, b_rows = [], []
    for (w, b) in params:
        w_mats.append(pack_weight_matrix(w, H, W, pad))
        b_rows.append(jnp.repeat(b, HW).reshape(1, b.shape[0] * HW))
    return jnp.stack(w_mats, axis=0), jnp.stack(b_rows, axis=0)


# ------------------------------- forward ------------------------------------

def model_forward(x1_nchw, x2_nchw, x3_nchw, w_all, b_all):
    # x2, x3 are unused, exactly as in the PyTorch forward.
    del x2_nchw, x3_nchw
    N, C, H, W = x1_nchw.shape
    # TODO(synk): the pool==x/4 identity and the reduced-tap dense packing are
    # only exact for the H=W=2 shapes at which the original module is
    # shape-valid; other shapes would need the general pool/im2col path.
    assert (H, W) == (2, 2), "module is only shape-valid for H=W=2"
    x_flat = x1_nchw.reshape(N, C * H * W).astype(jnp.float32)   # pure reshape
    out_flat = fused_forward(x_flat, w_all, b_all)
    return out_flat.reshape(N, C, H, W)                          # pure reshape


# ------------------------- pure-JAX reference check --------------------------

def reference_forward(x1_nchw, params):
    x = x1_nchw.astype(jnp.float32)
    xp = jnp.pad(x, ((0, 0), (0, 0), (1, 1), (1, 1)))
    v1 = lax.reduce_window(xp, 0.0, lax.add, (1, 1, 2, 2), (1, 1, 2, 2),
                           "VALID") / 4.0
    cur = x
    for (w, b) in params:
        conv = lax.conv_general_dilated(
            cur, w, window_strides=(1, 1), padding=((3, 3), (3, 3)),
            dimension_numbers=("NCHW", "OIHW", "NCHW"))
        cur = jnp.maximum(v1 + conv + b.reshape(1, -1, 1, 1), 0.0)
    return cur


# ---------------------------------- main -------------------------------------

if __name__ == "__main__":
    key = jax.random.PRNGKey(0)
    k1, k2, k3, kx1, kx2, kx3 = jax.random.split(key, 6)

    N, C, H, W = 4, 16, 2, 2
    params = [init_conv_params(k1, C, C, 7),
              init_conv_params(k2, C, C, 7),
              init_conv_params(k3, C, C, 7)]
    w_all, b_all = pack_params(params, H, W, pad=3)   # hoisted out of forward

    x1 = jax.random.normal(kx1, (N, C, H, W), jnp.float32)
    x2 = jax.random.normal(kx2, (N, C, H, W), jnp.float32)
    x3 = jax.random.normal(kx3, (N, C, H, W), jnp.float32)

    fwd = jax.jit(model_forward)
    out = fwd(x1, x2, x3, w_all, b_all)
    out = jax.block_until_ready(out)

    ref = reference_forward(x1, params)
    assert out.shape == (N, C, H, W)
    max_err = float(jnp.max(jnp.abs(out - ref)))
    assert jnp.allclose(out, ref, atol=1e-4, rtol=1e-4), max_err

    print("KERNEL_OK")
</pallas_src>

<mosaic_0001>
module attributes {stable_mosaic.version = 11 : i64} {
  func.func @_fused_forward_kernel(%arg0: memref<4x64xf32, #tpu.memory_space<vmem>>, %arg1: memref<3x64x64xf32, #tpu.memory_space<vmem>>, %arg2: memref<3x1x64xf32, #tpu.memory_space<vmem>>, %arg3: memref<4x64xf32, #tpu.memory_space<vmem>>) attributes {dimension_semantics = [], scalar_prefetch = 0 : i64, scratch_operands = 0 : i64, tpu.core_type = #tpu.core_type<tc>} {
    %c0 = arith.constant 0 : index
    %c0_0 = arith.constant 0 : index
    %0 = vector.load %arg0[%c0, %c0_0] : memref<4x64xf32, #tpu.memory_space<vmem>>, vector<4x64xf32>
    %cst = arith.constant 2.500000e-01 : f32
    %1 = vector.broadcast %cst : f32 to vector<4x64xf32>
    %2 = arith.mulf %0, %1 : vector<4x64xf32>
    %c0_1 = arith.constant 0 : index
    %c0_2 = arith.constant 0 : index
    %c0_3 = arith.constant 0 : index
    %3 = vector.load %arg2[%c0_1, %c0_2, %c0_3] : memref<3x1x64xf32, #tpu.memory_space<vmem>>, vector<1x1x64xf32>
    %4 = vector.shape_cast %3 : vector<1x1x64xf32> to vector<1x64xf32>
    %5 = vector.broadcast %4 : vector<1x64xf32> to vector<4x64xf32>
    %6 = arith.addf %2, %5 : vector<4x64xf32>
    %c1 = arith.constant 1 : index
    %c0_4 = arith.constant 0 : index
    %c0_5 = arith.constant 0 : index
    %7 = vector.load %arg2[%c1, %c0_4, %c0_5] : memref<3x1x64xf32, #tpu.memory_space<vmem>>, vector<1x1x64xf32>
    %8 = vector.shape_cast %7 : vector<1x1x64xf32> to vector<1x64xf32>
    %9 = vector.broadcast %8 : vector<1x64xf32> to vector<4x64xf32>
    %10 = arith.addf %2, %9 : vector<4x64xf32>
    %c2 = arith.constant 2 : index
    %c0_6 = arith.constant 0 : index
    %c0_7 = arith.constant 0 : index
    %11 = vector.load %arg2[%c2, %c0_6, %c0_7] : memref<3x1x64xf32, #tpu.memory_space<vmem>>, vector<1x1x64xf32>
    %12 = vector.shape_cast %11 : vector<1x1x64xf32> to vector<1x64xf32>
    %13 = vector.broadcast %12 : vector<1x64xf32> to vector<4x64xf32>
    %14 = arith.addf %2, %13 : vector<4x64xf32>
    %c0_8 = arith.constant 0 : index
    %c0_9 = arith.constant 0 : index
    %c0_10 = arith.constant 0 : index
    %15 = vector.load %arg1[%c0_8, %c0_9, %c0_10] : memref<3x64x64xf32, #tpu.memory_space<vmem>>, vector<1x64x64xf32>
    %16 = vector.shape_cast %15 : vector<1x64x64xf32> to vector<64x64xf32>
    %cst_11 = arith.constant dense<0.000000e+00> : vector<4x64xf32>
    %17 = tpu.matmul %0, %16, %cst_11 {dimension_numbers = #tpu.dot_dimension_numbers<[1], [0], [0], [1], [0, 0, 1, 1], [], []>} : vector<4x64xf32>, vector<64x64xf32>, vector<4x64xf32> -> vector<4x64xf32>
    %18 = arith.addf %17, %6 : vector<4x64xf32>
    %cst_12 = arith.constant 0.000000e+00 : f32
    %19 = vector.broadcast %cst_12 : f32 to vector<4x64xf32>
    %20 = arith.maximumf %18, %19 : vector<4x64xf32>
    %c1_13 = arith.constant 1 : index
    %c0_14 = arith.constant 0 : index
    %c0_15 = arith.constant 0 : index
    %21 = vector.load %arg1[%c1_13, %c0_14, %c0_15] : memref<3x64x64xf32, #tpu.memory_space<vmem>>, vector<1x64x64xf32>
    %22 = vector.shape_cast %21 : vector<1x64x64xf32> to vector<64x64xf32>
    %cst_16 = arith.constant dense<0.000000e+00> : vector<4x64xf32>
    %23 = tpu.matmul %20, %22, %cst_16 {dimension_numbers = #tpu.dot_dimension_numbers<[1], [0], [0], [1], [0, 0, 1, 1], [], []>} : vector<4x64xf32>, vector<64x64xf32>, vector<4x64xf32> -> vector<4x64xf32>
    %24 = arith.addf %23, %10 : vector<4x64xf32>
    %cst_17 = arith.constant 0.000000e+00 : f32
    %25 = vector.broadcast %cst_17 : f32 to vector<4x64xf32>
    %26 = arith.maximumf %24, %25 : vector<4x64xf32>
    %c2_18 = arith.constant 2 : index
    %c0_19 = arith.constant 0 : index
    %c0_20 = arith.constant 0 : index
    %27 = vector.load %arg1[%c2_18, %c0_19, %c0_20] : memref<3x64x64xf32, #tpu.memory_space<vmem>>, vector<1x64x64xf32>
    %28 = vector.shape_cast %27 : vector<1x64x64xf32> to vector<64x64xf32>
    %cst_21 = arith.constant dense<0.000000e+00> : vector<4x64xf32>
    %29 = tpu.matmul %26, %28, %cst_21 {dimension_numbers = #tpu.dot_dimension_numbers<[1], [0], [0], [1], [0, 0, 1, 1], [], []>} : vector<4x64xf32>, vector<64x64xf32>, vector<4x64xf32> -> vector<4x64xf32>
    %30 = arith.addf %29, %14 : vector<4x64xf32>
    %cst_22 = arith.constant 0.000000e+00 : f32
    %31 = vector.broadcast %cst_22 : f32 to vector<4x64xf32>
    %32 = arith.maximumf %30, %31 : vector<4x64xf32>
    %c0_23 = arith.constant 0 : index
    %c0_24 = arith.constant 0 : index
    %33 = vector.load %arg3[%c0_23, %c0_24] : memref<4x64xf32, #tpu.memory_space<vmem>>, vector<4x64xf32>
    tpu.vector_store %arg3[%c0_23, %c0_24], %32 {strides = array<i32>} : memref<4x64xf32, #tpu.memory_space<vmem>>, vector<4x64xf32>,
    return
  }
}

</mosaic_0001>

<bundles_post_ra>
// kernel: model_forward.1
= control target key start
LH: loop header
LB: loop body
LE: loop exit
PB: predicated region body
PF: predicated region fallthrough
CT: control target
= control target key end

     0   :  { %8 = vsyncpa [#allocation3], 0  ;;  %s470_s12 = smov [#allocation2]   ;;  %s541_s0 = inlined_call_operand.vmem [shape: f32[4,64], index: 0, kind: input, shape index: {}]   ;;  %s542_s1 = inlined_call_operand.hbm [shape: f32[3,64,64], index: 1, kind: input, shape index: {}]   ;;  %s543_s2 = inlined_call_operand.vmem [shape: f32[3,1,64], index: 2, kind: input, shape index: {}]   ;;  %s544_s3 = inlined_call_operand.vmem [shape: f32[4,64], index: 3, kind: output, shape index: {}]  }
   0x1   :  { %s16_s13 = sshll.u32 %s470_s12, 4  ;;  %s446_s16 = scalar_lea.hbm %s542_s1, 3072  ;;  %s17_s13 = int_to_ptr.vmem [resolvable:$true] %s16_s13 }
   0x2   :  { %p447_p0 = scmp.ne.s32.totalorder %s542_s1, %s446_s16  ;;  %p450_p1 = scmp.lt.u32.totalorder %s446_s16, %s542_s1 }
   0x4   :  { %p452_p2 = pnand %p450_p1, %p447_p0 }
   0x6   :  { %455 = shalt.err (!%p452_p2)
}
   0x7   :  { %s456_s21 = scalar_lea.vmem %s17_s13, 3072  ;;  %p461_p4 = scmp.lt.s32.totalorder %s17_s13, %s17_s13 }
   0x8   :  { %p457_p3 = scmp.ne.s32.totalorder %s17_s13, %s456_s21  ;;  %p462_p5 = scmp.lt.s32.totalorder %s456_s21, %s456_s21 }
   0xa   :  { %p463_p6 = por %p462_p5, %p461_p4 }
   0xc   :  { %p464_p7 = pnand %p463_p6, %p457_p3 }
   0xe   :  { %467 = shalt.err (!%p464_p7)
}
   0xf   :  { %s471_s22 = smov 128   ;;  %s472_s23 = smov 8  }
  0x10   :  { %22 = dma.hbm_to_vmem [thread:$0]  %s542_s1, 3072, %s17_s13, [#allocation3], %s471_s22, %s471_s22, %s472_s23  }
  0x11   :  { %468 = dma.done.wait [#allocation3], 3072  }
  0x12   :  { %469 = vsyncadd [#allocation3], 4294964224  ;;  %v473_v0 = vmov 0.0|0.0   ;;  %vm474_vm0 = vmmov 0   ;;  %v475_v1 = vmov 0.0   ;;  %v56_v2 = vld [vmem:[#allocation2] sm:$0xff] }
  0x13   :  { %404 = vmatprep.subr.bf16.mxu0 %v473_v0  ;;  %363 = vmatprep.mubr.msk.f32.mxu0 %vm474_vm0, %v475_v1  ;;  %v57_v3 = vld [vmem:[#allocation2 + $0x8] sm:$0xff]  ;;  %v58_v4 = vld [vmem:[#allocation2 + $0x10] sm:$0xff]  ;;  %v59_v6 = vld [vmem:[#allocation2 + $0x18] sm:$0xff]  ;;  %vm64_vm1 = vcmask 523264   ;;  %vm305_vm2 = vcmask 519168  }
  0x14   :  { %416 = vmatprep.subr.bf16.mxu1 %v473_v0  ;;  %382 = vmatprep.mubr.msk.f32.mxu1 %vm474_vm0, %v475_v1  ;;  %v405_v5 = vpack.c.bf16 %v57_v3, %v56_v2  ;;  %v408_v7 = vpack.c.bf16 %v59_v6, %v58_v4  ;;  %v140_v8 = vld [vmem:[#allocation2 + $0x40] sm:$0xff]  ;;  %v141_v9 = vld [vmem:[#allocation2 + $0x48] sm:$0xff]  ;;  %v142_v10 = vld [vmem:[#allocation2 + $0x50] sm:$0xff] }
  0x15   :  { %v60_v11 = vld [vmem:[#allocation2 + $0x20] sm:$0xff]  ;;  %v61_v12 = vld [vmem:[#allocation2 + $0x28] sm:$0xff]  ;;  %v417_v13 = vpack.c.bf16 %v141_v9, %v140_v8  ;;  %v143_v14 = vld [vmem:[#allocation2 + $0x58] sm:$0xff] }
  0x16   :  { %406 = vmatpush3.bf16.msra.mxu0 %v405_v5  ;;  %v420_v15 = vpack.c.bf16 %v143_v14, %v142_v10  ;;  %v411_v16 = vpack.c.bf16 %v61_v12, %v60_v11  ;;  %v144_v17 = vld [vmem:[#allocation2 + $0x60] sm:$0xff]  ;;  %v145_v18 = vld [vmem:[#allocation2 + $0x68] sm:$0xff]  ;;  %v62_v19 = vld [vmem:[#allocation2 + $0x30] sm:$0xff] }
  0x17   :  { %407 = vmatprep.subr.bf16.mxu0 %v473_v0  ;;  %418 = vmatpush3.bf16.msra.mxu1 %v417_v13  ;;  %v63_v20 = vld [vmem:[#allocation2 + $0x38] sm:$0xff]  ;;  %v423_v21 = vpack.c.bf16 %v145_v18, %v144_v17  ;;  %v28_v23 = vld [vmem:[%s541_s0] sm:$0xf]  ;;  %v146_v24 = vld [vmem:[#allocation2 + $0x70] sm:$0xff] }
  0x18   :  { %419 = vmatprep.subr.bf16.mxu1 %v473_v0  ;;  %v414_v22 = vpack.c.bf16 %v63_v20, %v62_v19  ;;  %v147_v25 = vld [vmem:[#allocation2 + $0x78] sm:$0xff]  ;;  %v223_v27 = vld [vmem:[#allocation2 + $0x80] sm:$0xff]  ;;  %v224_v28 = vld [vmem:[#allocation2 + $0x88] sm:$0xff]  ;;  %v29_v36 = vmul.f32 0.25, %v28_v23 }
  0x19   :  { %v426_v26 = vpack.c.bf16 %v147_v25, %v146_v24  ;;  %v225_v29 = vld [vmem:[#allocation2 + $0x90] sm:$0xff]  ;;  %v429_v30 = vpack.c.bf16 %v224_v28, %v223_v27  ;;  %v226_v31 = vld [vmem:[#allocation2 + $0x98] sm:$0xff]  ;;  %v227_v33 = vld [vmem:[#allocation2 + $0xa0] sm:$0xff] }
  0x1a   :  { %409 = vmatpush3.bf16.msra.mxu0 %v408_v7  ;;  %v432_v32 = vpack.c.bf16 %v226_v31, %v225_v29  ;;  %v228_v34 = vld [vmem:[#allocation2 + $0xa8] sm:$0xff]  ;;  %v312_v37 = vld [vmem:[%s543_s2] ss:$0 sm:$0xff]  ;;  %v229_v43 = vld [vmem:[#allocation2 + $0xb0] sm:$0xff] }
  0x1b   :  { %410 = vmatprep.subr.bf16.mxu0 %v473_v0  ;;  %421 = vmatpush3.bf16.msra.mxu1 %v420_v15  ;;  %v435_v35 = vpack.c.bf16 %v228_v34, %v227_v33  ;;  %v37_v38 = vadd.f32 %v312_v37, %v29_v36  ;;  %v230_v44 = vld [vmem:[#allocation2 + $0xb8] sm:$0xff]  ;;  %v314_v46 = vld [vmem:[%s543_s2 + $0x1] ss:$0 sm:$0xff]  ;;  %v316_v52 = vld [vmem:[%s543_s2 + $0x2] ss:$0 sm:$0xff] }
  0x1c   :  { %422 = vmatprep.subr.bf16.mxu1 %v473_v0  ;;  %v438_v45 = vpack.c.bf16 %v230_v44, %v229_v43  ;;  %v46_v47 = vadd.f32 %v314_v46, %v29_v36  ;;  %v55_v53 = vadd.f32 %v316_v52, %v29_v36 }
  0x1e   :  { %412 = vmatpush3.bf16.msra.mxu0 %v411_v16 }
  0x1f   :  { %413 = vmatprep.subr.bf16.mxu0 %v473_v0  ;;  %424 = vmatpush3.bf16.msra.mxu1 %v423_v21 }
  0x20   :  { %425 = vmatprep.subr.bf16.mxu1 %v473_v0 }
  0x22   :  { %415 = vmatpush3.bf16.msra.mxu0 %v414_v22 }
  0x23   :  { %428 = vmatprep.subr.bf16.mxu0 %v473_v0  ;;  %427 = vmatpush3.bf16.msra.mxu1 %v426_v26 }
  0x25   :  { %364 = vmatmul.mubr.msk.f32.vlgmr.msra.gmra.mrb[0].mxu0 %vm64_vm1, %v28_v23 }
  0x26   :  { %401 = vmatprep.mubr.msk.f32.mxu0 %vm474_vm0, %v475_v1  ;;  %430 = vmatpush3.bf16.msra.mxu0 %v429_v30 }
  0x27   :  { %431 = vmatprep.subr.bf16.mxu0 %v473_v0 }
  0x2a   :  { %433 = vmatpush3.bf16.msra.mxu0 %v432_v32 }
  0x2b   :  { %434 = vmatprep.subr.bf16.mxu0 %v473_v0 }
  0x2e   :  { %436 = vmatpush3.bf16.msra.mxu0 %v435_v35 }
  0x2f   :  { %437 = vmatprep.subr.bf16.mxu0 %v473_v0 }
  0x32   :  { %439 = vmatpush3.bf16.msra.mxu0 %v438_v45 }
  0xf8   :  { %v134_v39 = vpop.f32.mrb[0].mxu0 }
  0xf9   :  { %v135_v40 = vadd.f32 %v134_v39, %v37_v38  ;;  %v365_v41 = vpop.f32.mrb[1].mxu0 }
  0xfb   :  { %v138_v42 = vmax.f32 %v135_v40, 0.0 }
  0xfd   :  { %383 = vmatmul.mubr.msk.f32.vlgmr.msra.gmra.mrb[0].mxu1 %vm64_vm1, %v138_v42 }
 0x1d0   :  { %v217_v48 = vpop.f32.mrb[0].mxu1 }
 0x1d1   :  { %v218_v49 = vadd.f32 %v217_v48, %v46_v47  ;;  %v384_v50 = vpop.f32.mrb[1].mxu1 }
 0x1d3   :  { %v221_v51 = vmax.f32 %v218_v49, 0.0 }
 0x1d5   :  { %402 = vmatmul.mubr.msk.f32.vlgmr.msra.gmra.mrb[2].mxu0 %vm64_vm1, %v221_v51 }
 0x2a8   :  { %v300_v54 = vpop.f32.mrb[2].mxu0 }
 0x2a9   :  { %v301_v55 = vadd.f32 %v300_v54, %v55_v53  ;;  %v403_v56 = vpop.f32.mrb[3].mxu0 }
 0x2ab   :  { %v304_v57 = vmax.f32 %v301_v55, 0.0 }
 0x2ad   :  { %306 = vst.msk [vmem:[%s544_s3] sm:$0xf] %vm305_vm2, %v304_v57 }
 0x2ae   :  { %311 = vsyncpa [#allocation3], 1 }

</bundles_post_ra>
